<compile_context>
chip_gen: v7x
topology: tpu7x:2x2x1
jax: 0.10.0
libtpu: 0.0.40
codegen_flags: <defaults>
</compile_context>

<pallas_src>
import jax
import jax.numpy as jnp
from jax.experimental import pallas as pl
from jax.experimental.pallas import tpu as pltpu


def _skipgram_kernel(neg_ids_ref,            # SMEM  (num_tiles*K*TB,) int32  (scalar prefetch)
                     center_ref,             # VMEM  (TB, D) f32
                     context_ref,            # VMEM  (TB, D) f32
                     emb_out_hbm,            # ANY   (V, D)  f32  (raw table, no auto-DMA)
                     scores_ref,             # VMEM  (TB, 1+K) f32   out
                     nbuf,                   # VMEM  (K*TB, D) f32   scratch (k-major)
                     sem):                   # DMA semaphore (1,)
    i = pl.program_id(0)
    TB, D = center_ref.shape
    KTB = nbuf.shape[0]          # K * TB
    K = KTB // TB
    base = i * KTB               # flat offset of this tile's (k-major) neg ids

    # --- fused gather: one row DMA per (negative k, tile row r), straight
    #     from the HBM-resident embedding table into VMEM scratch. ----------
    @pl.loop(0, KTB)
    def _issue(j):
        row_id = neg_ids_ref[base + j]
        pltpu.make_async_copy(emb_out_hbm.at[row_id], nbuf.at[j], sem.at[0]).start()

    # All row copies have identical (D,) shape, so drain with same-shaped
    # dummy-descriptor waits (one wait per issued copy).
    @pl.loop(0, KTB)
    def _drain(j):
        pltpu.make_async_copy(emb_out_hbm.at[0], nbuf.at[0], sem.at[0]).wait()

    # --- compute: pos + neg scores into one lane-contiguous block ----------
    c = center_ref[...]                                    # (TB, D)
    x = context_ref[...]                                   # (TB, D)

    cols = [jnp.sum(c * x, axis=-1, keepdims=True)]        # pos score -> col 0
    for k in range(K):                                     # small static unroll
        nk = nbuf[pl.ds(k * TB, TB), :]                    # (TB, D) static slice
        cols.append(jnp.sum(nk * c, axis=-1, keepdims=True))
    scores_ref[...] = jnp.concatenate(cols, axis=-1)       # (TB, 1+K)


def skipgram_forward(emb_in, emb_out, center_word, context_words,
                     negative_samples, *, tile_b=64):
    """JAX wrapper reproducing SkipGram.forward.

    emb_in:  (V, D) f32   -- embeddings_input.weight
    emb_out: (V, D) f32   -- embeddings_output.weight
    center_word:      (B, 1) int
    context_words:    (B, 1) int
    negative_samples: (B, K) int
    returns (pos_score: (B,), neg_score: (B, K))
    """
    emb_in = emb_in.astype(jnp.float32)
    emb_out = emb_out.astype(jnp.float32)
    V, D = emb_in.shape
    B = center_word.shape[0]
    K = negative_samples.shape[1]

    # Small glue gathers (2*B*D) -- fed to the kernel via pipelined BlockSpecs.
    center_embeds = jnp.take(emb_in, center_word.reshape(-1), axis=0)    # (B, D)
    context_embeds = jnp.take(emb_out, context_words.reshape(-1), axis=0)  # (B, D)

    # Batch tiling.  Keep TB*K*D*4 (scratch) + 2x double-buffered (TB,D)
    # inputs well under the scoped VMEM limit (32 MiB default; v7x: 64 MiB
    # physical) -- tile_b=64 is a few hundred KiB for typical K/D.
    TB = min(tile_b, B)
    num_tiles = -(-B // TB)
    Bp = num_tiles * TB
    neg_ids = negative_samples.astype(jnp.int32)
    if Bp != B:
        pad = Bp - B
        center_embeds = jnp.pad(center_embeds, ((0, pad), (0, 0)))
        context_embeds = jnp.pad(context_embeds, ((0, pad), (0, 0)))
        neg_ids = jnp.pad(neg_ids, ((0, pad), (0, 0)))      # pad rows gather row 0

    # Permute neg ids to k-major within each batch tile so the kernel's flat
    # scratch index is simply (tile_offset + j).
    neg_ids_perm = neg_ids.reshape(num_tiles, TB, K).transpose(0, 2, 1).reshape(-1)

    scores = pl.pallas_call(
        _skipgram_kernel,
        out_shape=jax.ShapeDtypeStruct((Bp, 1 + K), jnp.float32),
        grid_spec=pltpu.PrefetchScalarGridSpec(
            num_scalar_prefetch=1,
            grid=(num_tiles,),
            in_specs=[
                pl.BlockSpec((TB, D), lambda i, ids: (i, 0)),   # center
                pl.BlockSpec((TB, D), lambda i, ids: (i, 0)),   # context
                pl.BlockSpec(memory_space=pl.ANY),              # emb_out table (HBM)
            ],
            out_specs=pl.BlockSpec((TB, 1 + K), lambda i, ids: (i, 0)),
            scratch_shapes=[
                pltpu.VMEM((TB * K, D), jnp.float32),           # gathered negatives
                pltpu.SemaphoreType.DMA((1,)),
            ],
        ),
        compiler_params=pltpu.CompilerParams(
            dimension_semantics=("parallel",),                  # megacore on v7x
        ),
    )(neg_ids_perm, center_embeds, context_embeds, emb_out)

    scores = scores[:B]
    return scores[:, 0], scores[:, 1:]


if __name__ == "__main__":
    # Small, deterministic setup consistent with the module's __init__/forward.
    vocab_size = 64
    embedding_dim = 128        # lane-dense D (multiple of 128)
    batch = 8
    num_neg = 8

    initrange = 0.5 / embedding_dim
    key = jax.random.PRNGKey(0)
    k1, k2, k3, k4, k5 = jax.random.split(key, 5)

    emb_in = jax.random.uniform(
        k1, (vocab_size, embedding_dim), jnp.float32, -initrange, initrange)
    emb_out = jax.random.uniform(
        k2, (vocab_size, embedding_dim), jnp.float32, -initrange, initrange)

    center_word = jax.random.randint(k3, (batch, 1), 0, vocab_size, jnp.int32)
    context_words = jax.random.randint(k4, (batch, 1), 0, vocab_size, jnp.int32)
    negative_samples = jax.random.randint(
        k5, (batch, num_neg), 0, vocab_size, jnp.int32)

    pos_score, neg_score = skipgram_forward(
        emb_in, emb_out, center_word, context_words, negative_samples)
    jax.block_until_ready((pos_score, neg_score))

    # Reference check in plain JAX.
    ce = jnp.take(emb_in, center_word[:, 0], axis=0)
    cx = jnp.take(emb_out, context_words[:, 0], axis=0)
    ne = jnp.take(emb_out, negative_samples, axis=0)
    pos_ref = jnp.sum(ce * cx, axis=1)
    neg_ref = jnp.einsum("bkd,bd->bk", ne, ce)
    assert pos_score.shape == (batch,)
    assert neg_score.shape == (batch, num_neg)
    assert jnp.allclose(pos_score, pos_ref, atol=1e-6)
    assert jnp.allclose(neg_score, neg_ref, atol=1e-6)

    print("KERNEL_OK")
</pallas_src>

<mosaic_0001>
module attributes {stable_mosaic.version = 11 : i64} {
  func.func @_skipgram_kernel(%arg0: i32, %arg1: memref<64xi32, #tpu.memory_space<smem>>, %arg2: memref<8x128xf32, #tpu.memory_space<vmem>>, %arg3: memref<8x128xf32, #tpu.memory_space<vmem>>, %arg4: memref<64x128xf32, #tpu.memory_space<any>>, %arg5: memref<8x9xf32, #tpu.memory_space<vmem>>, %arg6: memref<64x128xf32, #tpu.memory_space<vmem>>, %arg7: memref<1x!tpu.dma_semaphore, #tpu.memory_space<semaphore_mem>>) attributes {dimension_semantics = [#tpu.dimension_semantics<parallel>], iteration_bounds = array<i64: 1>, scalar_prefetch = 1 : i64, scratch_operands = 2 : i64, tpu.core_type = #tpu.core_type<tc>, window_params = [{transform_indices = @transform_0, window_bounds = array<i64: 8, 128>}, {transform_indices = @transform_1, window_bounds = array<i64: 8, 128>}, {}, {transform_indices = @transform_3, window_bounds = array<i64: 8, 9>}]} {
    %c64_i32 = arith.constant 64 : i32
    %0 = arith.muli %arg0, %c64_i32 : i32
    %c0_i32 = arith.constant 0 : i32
    %c64_i32_0 = arith.constant 64 : i32
    %1 = arith.addi %c0_i32, %c64_i32_0 : i32
    %c1_i32 = arith.constant 1 : i32
    scf.for %arg8 = %c0_i32 to %1 step %c1_i32  : i32 {
      %c1_i32_27 = arith.constant 1 : i32
      %42 = arith.muli %arg8, %c1_i32_27 : i32
      %c0_i32_28 = arith.constant 0 : i32
      %43 = arith.addi %c0_i32_28, %42 : i32
      %44 = arith.addi %0, %43 : i32
      %45 = arith.index_cast %44 : i32 to index
      %46 = memref.load %arg1[%45] : memref<64xi32, #tpu.memory_space<smem>>
      %c0_i32_29 = arith.constant 0 : i32
      %c0_i32_30 = arith.constant 0 : i32
      %47 = tpu.memref_slice %arg4[%46, %c0_i32_30] : memref<64x128xf32, #tpu.memory_space<any>> -> memref<1x128xf32, #tpu.memory_space<any>>
      %48 = tpu.memref_squeeze %47 : memref<1x128xf32, #tpu.memory_space<any>> -> memref<128xf32, #tpu.memory_space<any>>
      %c0_i32_31 = arith.constant 0 : i32
      %49 = tpu.memref_slice %arg6[%43, %c0_i32_31] : memref<64x128xf32, #tpu.memory_space<vmem>> -> memref<1x128xf32, #tpu.memory_space<vmem>>
      %50 = tpu.memref_squeeze %49 : memref<1x128xf32, #tpu.memory_space<vmem>> -> memref<128xf32, #tpu.memory_space<vmem>>
      %51 = tpu.memref_slice %arg7[%c0_i32_29] : memref<1x!tpu.dma_semaphore, #tpu.memory_space<semaphore_mem>> -> memref<1x!tpu.dma_semaphore, #tpu.memory_space<semaphore_mem>>
      %52 = tpu.memref_squeeze %51 : memref<1x!tpu.dma_semaphore, #tpu.memory_space<semaphore_mem>> -> memref<!tpu.dma_semaphore, #tpu.memory_space<semaphore_mem>>
      tpu.enqueue_dma source(%48 : memref<128xf32, #tpu.memory_space<any>>) target(%50 : memref<128xf32, #tpu.memory_space<vmem>>) target_semaphore(%52 : memref<!tpu.dma_semaphore, #tpu.memory_space<semaphore_mem>>)
    }
    %c64_i32_1 = arith.constant 64 : i32
    %c0_i32_2 = arith.constant 0 : i32
    %c64_i32_3 = arith.constant 64 : i32
    %2 = arith.addi %c0_i32_2, %c64_i32_3 : i32
    %c1_i32_4 = arith.constant 1 : i32
    scf.for %arg8 = %c0_i32_2 to %2 step %c1_i32_4  : i32 {
      %c0_i32_27 = arith.constant 0 : i32
      %c0_i32_28 = arith.constant 0 : i32
      %c0_i32_29 = arith.constant 0 : i32
      %c0_i32_30 = arith.constant 0 : i32
      %42 = tpu.memref_slice %arg4[%c0_i32_27, %c0_i32_30] : memref<64x128xf32, #tpu.memory_space<any>> -> memref<1x128xf32, #tpu.memory_space<any>>
      %43 = tpu.memref_squeeze %42 : memref<1x128xf32, #tpu.memory_space<any>> -> memref<128xf32, #tpu.memory_space<any>>
      %c0_i32_31 = arith.constant 0 : i32
      %44 = tpu.memref_slice %arg6[%c0_i32_28, %c0_i32_31] : memref<64x128xf32, #tpu.memory_space<vmem>> -> memref<1x128xf32, #tpu.memory_space<vmem>>
      %45 = tpu.memref_squeeze %44 : memref<1x128xf32, #tpu.memory_space<vmem>> -> memref<128xf32, #tpu.memory_space<vmem>>
      %46 = tpu.memref_slice %arg7[%c0_i32_29] : memref<1x!tpu.dma_semaphore, #tpu.memory_space<semaphore_mem>> -> memref<1x!tpu.dma_semaphore, #tpu.memory_space<semaphore_mem>>
      %47 = tpu.memref_squeeze %46 : memref<1x!tpu.dma_semaphore, #tpu.memory_space<semaphore_mem>> -> memref<!tpu.dma_semaphore, #tpu.memory_space<semaphore_mem>>
      tpu.wait_dma2 semaphore(%47 : memref<!tpu.dma_semaphore, #tpu.memory_space<semaphore_mem>>) src(%43 : memref<128xf32, #tpu.memory_space<any>>) dst(%45 : memref<128xf32, #tpu.memory_space<vmem>>)
    }
    %c0 = arith.constant 0 : index
    %c0_5 = arith.constant 0 : index
    %3 = vector.load %arg2[%c0, %c0_5] : memref<8x128xf32, #tpu.memory_space<vmem>>, vector<8x128xf32>
    %c0_6 = arith.constant 0 : index
    %c0_7 = arith.constant 0 : index
    %4 = vector.load %arg3[%c0_6, %c0_7] : memref<8x128xf32, #tpu.memory_space<vmem>>, vector<8x128xf32>
    %5 = arith.mulf %3, %4 : vector<8x128xf32>
    %cst = arith.constant dense<0.000000e+00> : vector<8xf32>
    %6 = vector.multi_reduction <add>, %5, %cst [1] : vector<8x128xf32> to vector<8xf32>
    %7 = vector.shape_cast %6 : vector<8xf32> to vector<8x1xf32>
    %c0_8 = arith.constant 0 : index
    %c0_9 = arith.constant 0 : index
    %8 = vector.load %arg6[%c0_8, %c0_9] : memref<64x128xf32, #tpu.memory_space<vmem>>, vector<8x128xf32>
    %9 = arith.mulf %8, %3 : vector<8x128xf32>
    %cst_10 = arith.constant dense<0.000000e+00> : vector<8xf32>
    %10 = vector.multi_reduction <add>, %9, %cst_10 [1] : vector<8x128xf32> to vector<8xf32>
    %11 = vector.shape_cast %10 : vector<8xf32> to vector<8x1xf32>
    %c8 = arith.constant 8 : index
    %c0_11 = arith.constant 0 : index
    %12 = vector.load %arg6[%c8, %c0_11] : memref<64x128xf32, #tpu.memory_space<vmem>>, vector<8x128xf32>
    %13 = arith.mulf %12, %3 : vector<8x128xf32>
    %cst_12 = arith.constant dense<0.000000e+00> : vector<8xf32>
    %14 = vector.multi_reduction <add>, %13, %cst_12 [1] : vector<8x128xf32> to vector<8xf32>
    %15 = vector.shape_cast %14 : vector<8xf32> to vector<8x1xf32>
    %c16 = arith.constant 16 : index
    %c0_13 = arith.constant 0 : index
    %16 = vector.load %arg6[%c16, %c0_13] : memref<64x128xf32, #tpu.memory_space<vmem>>, vector<8x128xf32>
    %17 = arith.mulf %16, %3 : vector<8x128xf32>
    %cst_14 = arith.constant dense<0.000000e+00> : vector<8xf32>
    %18 = vector.multi_reduction <add>, %17, %cst_14 [1] : vector<8x128xf32> to vector<8xf32>
    %19 = vector.shape_cast %18 : vector<8xf32> to vector<8x1xf32>
    %c24 = arith.constant 24 : index
    %c0_15 = arith.constant 0 : index
    %20 = vector.load %arg6[%c24, %c0_15] : memref<64x128xf32, #tpu.memory_space<vmem>>, vector<8x128xf32>
    %21 = arith.mulf %20, %3 : vector<8x128xf32>
    %cst_16 = arith.constant dense<0.000000e+00> : vector<8xf32>
    %22 = vector.multi_reduction <add>, %21, %cst_16 [1] : vector<8x128xf32> to vector<8xf32>
    %23 = vector.shape_cast %22 : vector<8xf32> to vector<8x1xf32>
    %c32 = arith.constant 32 : index
    %c0_17 = arith.constant 0 : index
    %24 = vector.load %arg6[%c32, %c0_17] : memref<64x128xf32, #tpu.memory_space<vmem>>, vector<8x128xf32>
    %25 = arith.mulf %24, %3 : vector<8x128xf32>
    %cst_18 = arith.constant dense<0.000000e+00> : vector<8xf32>
    %26 = vector.multi_reduction <add>, %25, %cst_18 [1] : vector<8x128xf32> to vector<8xf32>
    %27 = vector.shape_cast %26 : vector<8xf32> to vector<8x1xf32>
    %c40 = arith.constant 40 : index
    %c0_19 = arith.constant 0 : index
    %28 = vector.load %arg6[%c40, %c0_19] : memref<64x128xf32, #tpu.memory_space<vmem>>, vector<8x128xf32>
    %29 = arith.mulf %28, %3 : vector<8x128xf32>
    %cst_20 = arith.constant dense<0.000000e+00> : vector<8xf32>
    %30 = vector.multi_reduction <add>, %29, %cst_20 [1] : vector<8x128xf32> to vector<8xf32>
    %31 = vector.shape_cast %30 : vector<8xf32> to vector<8x1xf32>
    %c48 = arith.constant 48 : index
    %c0_21 = arith.constant 0 : index
    %32 = vector.load %arg6[%c48, %c0_21] : memref<64x128xf32, #tpu.memory_space<vmem>>, vector<8x128xf32>
    %33 = arith.mulf %32, %3 : vector<8x128xf32>
    %cst_22 = arith.constant dense<0.000000e+00> : vector<8xf32>
    %34 = vector.multi_reduction <add>, %33, %cst_22 [1] : vector<8x128xf32> to vector<8xf32>
    %35 = vector.shape_cast %34 : vector<8xf32> to vector<8x1xf32>
    %c56 = arith.constant 56 : index
    %c0_23 = arith.constant 0 : index
    %36 = vector.load %arg6[%c56, %c0_23] : memref<64x128xf32, #tpu.memory_space<vmem>>, vector<8x128xf32>
    %37 = arith.mulf %36, %3 : vector<8x128xf32>
    %cst_24 = arith.constant dense<0.000000e+00> : vector<8xf32>
    %38 = vector.multi_reduction <add>, %37, %cst_24 [1] : vector<8x128xf32> to vector<8xf32>
    %39 = vector.shape_cast %38 : vector<8xf32> to vector<8x1xf32>
    %40 = tpu.concatenate %7, %11, %15, %19, %23, %27, %31, %35, %39 in 1 : vector<8x1xf32>, vector<8x1xf32>, vector<8x1xf32>, vector<8x1xf32>, vector<8x1xf32>, vector<8x1xf32>, vector<8x1xf32>, vector<8x1xf32>, vector<8x1xf32> -> vector<8x9xf32>
    %c0_25 = arith.constant 0 : index
    %c0_26 = arith.constant 0 : index
    %41 = vector.load %arg5[%c0_25, %c0_26] : memref<8x9xf32, #tpu.memory_space<vmem>>, vector<8x9xf32>
    tpu.vector_store %arg5[%c0_25, %c0_26], %40 {strides = array<i32>} : memref<8x9xf32, #tpu.memory_space<vmem>>, vector<8x9xf32>,
    return
  }
  func.func @transform_0(%arg0: i32, %arg1: memref<64xi32, #tpu.memory_space<smem>>) -> (i32, i32) {
    %c0_i32 = arith.constant 0 : i32
    %c0_i32_0 = arith.constant 0 : i32
    return %arg0, %c0_i32 : i32, i32
  }
  func.func @transform_1(%arg0: i32, %arg1: memref<64xi32, #tpu.memory_space<smem>>) -> (i32, i32) {
    %c0_i32 = arith.constant 0 : i32
    %c0_i32_0 = arith.constant 0 : i32
    return %arg0, %c0_i32 : i32, i32
  }
  func.func @transform_3(%arg0: i32, %arg1: memref<64xi32, #tpu.memory_space<smem>>) -> (i32, i32) {
    %c0_i32 = arith.constant 0 : i32
    %c0_i32_0 = arith.constant 0 : i32
    return %arg0, %c0_i32 : i32, i32
  }
}

</mosaic_0001>

<bundles_post_ra>
// kernel: tpu_custom_call.1
= control target key start
LH: loop header
LB: loop body
LE: loop exit
PB: predicated region body
PF: predicated region fallthrough
CT: control target
= control target key end

     0   :  { %s408_s0 = inlined_call_operand.hbm [shape: s32[64], index: 0, kind: input, shape index: {}]   ;;  %s409_s1 = inlined_call_operand.hbm [shape: f32[8,128], index: 1, kind: input, shape index: {}]   ;;  %s410_s2 = inlined_call_operand.hbm [shape: f32[8,128], index: 2, kind: input, shape index: {}]   ;;  %s411_s3 = inlined_call_operand.hbm [shape: f32[64,128], index: 3, kind: input, shape index: {}]   ;;  %s412_s4 = inlined_call_operand.hbm [shape: f32[8,9], index: 4, kind: output, shape index: {}]  }
   0x1   :  { %s185_s17 = scalar_lea.hbm %s408_s0, 16 }
   0x2   :  { %p186_p0 = scmp.ne.s32.totalorder %s408_s0, %s185_s17  ;;  %p189_p1 = scmp.lt.u32.totalorder %s185_s17, %s408_s0 }
   0x4   :  { %p191_p2 = pnand %p189_p1, %p186_p0 }
   0x6   :  { %194 = shalt.err (!%p191_p2)  }
   0x7   :  { %s311_s22 = smov [#allocation5]  }
   0x8   :  { %10 = dma.hbm_to_smem %s408_s0, 16, %s311_s22, [#allocation4] }
   0x9   :  { %293 = dma.done.wait [#allocation4], 16 }
   0xa   :  { %294 = vsyncadd [#allocation4], 4294967280 }
   0xb   :  { %12 = sfence }
   0xc   :  { %13 = vsyncpa [#allocation7], 0 }
   0xd   :  { %14 = vsyncpa [#allocation10], 0 }
   0xe   :  { %15 = vsyncpa [#allocation8], 0  ;;  %s312_s25 = smov [#allocation6]   ;;  %s313_s27 = smov [#allocation9]  }
   0xf   :  { %s22_s26 = sshll.u32 %s312_s25, 4  ;;  %s32_s28 = sshll.u32 %s313_s27, 4  ;;  %s23_s26 = int_to_ptr.vmem [resolvable:$true] %s22_s26  ;;  %s33_s28 = int_to_ptr.vmem [resolvable:$true] %s32_s28 }
  0x10   :  { %s195_s5 = scalar_lea.hbm %s409_s1, 128 }
  0x11   :  { %p196_p3 = scmp.ne.s32.totalorder %s409_s1, %s195_s5  ;;  %p199_p4 = scmp.lt.u32.totalorder %s195_s5, %s409_s1 }
  0x13   :  { %p201_p5 = pnand %p199_p4, %p196_p3 }
  0x15   :  { %204 = shalt.err (!%p201_p5)
}
  0x16   :  { %s205_s9 = scalar_lea.vmem %s23_s26, 128  ;;  %p210_p7 = scmp.lt.s32.totalorder %s23_s26, %s23_s26 }
  0x17   :  { %p206_p6 = scmp.ne.s32.totalorder %s23_s26, %s205_s9  ;;  %p211_p8 = scmp.lt.s32.totalorder %s205_s9, %s205_s9 }
  0x19   :  { %p212_p9 = por %p211_p8, %p210_p7 }
  0x1b   :  { %p213_p10 = pnand %p212_p9, %p206_p6 }
  0x1d   :  { %216 = shalt.err (!%p213_p10)
}
  0x1e   :  { %25 = dma.hbm_to_vmem [thread:$0]  %s409_s1, 128, %s23_s26, [#allocation7]  }
  0x1f   :  { %s217_s14 = scalar_lea.hbm %s410_s2, 128 }
  0x20   :  { %p218_p11 = scmp.ne.s32.totalorder %s410_s2, %s217_s14  ;;  %p221_p12 = scmp.lt.u32.totalorder %s217_s14, %s410_s2 }
  0x22   :  { %p223_p13 = pnand %p221_p12, %p218_p11 }
  0x24   :  { %226 = shalt.err (!%p223_p13)
}
  0x25   :  { %s227_s19 = scalar_lea.vmem %s33_s28, 128  ;;  %p232_p1 = scmp.lt.s32.totalorder %s33_s28, %s33_s28 }
  0x26   :  { %p228_p0 = scmp.ne.s32.totalorder %s33_s28, %s227_s19  ;;  %p233_p2 = scmp.lt.s32.totalorder %s227_s19, %s227_s19 }
  0x28   :  { %p234_p3 = por %p233_p2, %p232_p1 }
  0x2a   :  { %p235_p4 = pnand %p234_p3, %p228_p0 }
  0x2c   :  { %238 = shalt.err (!%p235_p4)
}
  0x2d   :  { %35 = dma.hbm_to_vmem [thread:$0]  %s410_s2, 128, %s33_s28, [#allocation10]  }
  0x2e   :  { %295 = dma.done.wait [#allocation7], 128  }
  0x2f   :  { %296 = vsyncadd [#allocation7], 4294967168 }
  0x30   :  { %297 = dma.done.wait [#allocation10], 128  }
  0x31   :  { %298 = vsyncadd [#allocation10], 4294967168  ;;  %s377_s21 = smov 0  }
  0x32 LB: > { %s50_s22 = sld [smem:[#allocation5 + %s305_s21]]  ;;  %s53_s23 = scalar_lea.vmem [#allocation2], %s305_s21  ;;  %s305_s21 = sphi %s377_s21, %s48_s21  }
  0x33   : > { %s61_s24 = sshll.u32 %s53_s23, 4  ;;  %s241_s5 = scalar_lea.hbm %s411_s3, 1024  ;;  %s62_s24 = int_to_ptr.vmem [resolvable:$true] %s61_s24 }
  0x38   : > { %s163_s25 = sshll.u32 %s50_s22, 4 }
  0x39   : > { %s52_s27 = scalar_lea.hbm %s411_s3, %s163_s25 }
  0x3a   : > { %s239_s28 = scalar_lea.hbm %s52_s27, 16  ;;  %p242_p6 = scmp.lt.u32.totalorder %s52_s27, %s411_s3 }
  0x3b   : > { %p240_p5 = scmp.ne.s32.totalorder %s52_s27, %s239_s28  ;;  %p243_p7 = scmp.lt.u32.totalorder %s241_s5, %s239_s28 }
  0x3c   : > { %p245_p9 = scmp.lt.u32.totalorder %s239_s28, %s52_s27 }
  0x3d   : > { %p244_p8 = por %p243_p7, %p242_p6 }
  0x3f   : > { %p246_p10 = por %p245_p9, %p244_p8 }
  0x41   : > { %p247_p11 = pnand %p246_p10, %p240_p5 }
  0x43   : > { %250 = shalt.err (!%p247_p11)  }
  0x44   : > { %s251_s0 = scalar_lea.vmem %s62_s24, 16  ;;  %s314_s8 = smov [#allocation2]  }
  0x45   : > { %p252_p12 = scmp.ne.s32.totalorder %s62_s24, %s251_s0  ;;  %s253_s9 = sshll.u32 %s314_s8, 4  ;;  %s254_s9 = int_to_ptr.vmem [resolvable:$false] %s253_s9 }
  0x46   : > { %s255_s10 = scalar_lea.vmem %s254_s9, 1024  ;;  %p256_p13 = scmp.lt.s32.totalorder %s62_s24, %s254_s9 }
  0x47   : > { %p257_p0 = scmp.lt.s32.totalorder %s255_s10, %s251_s0 }
  0x49   : > { %p258_p1 = por %p257_p0, %p256_p13 }
  0x4b   : > { %p259_p2 = pnand %p258_p1, %p252_p12 }
  0x4d   : > { %262 = shalt.err (!%p259_p2)  }
  0x4e   : > { %64 = dma.hbm_to_vmem [thread:$0]  %s52_s27, 16, %s62_s24, [#allocation3] }
  0x4f   : > { %s48_s21 = sadd.s32 1, %s305_s21  }
  0x50   : > { %p45_p3 = scmp.ge.s32.totalorder %s48_s21, 64  }
  0x51   :  { %s307_s11 = smov (%p45_p3), 0  }
  0x52   :  { %47 = sbr.rel (!%p45_p3) target bundleno = 50 (0x32), region = 56 }
  0x59 LB: > { %299 = dma.done.wait [#allocation3], 16  ;;  %s309_s11 = sphi %s307_s11, %s70_s11  }
  0x5a   : > { %300 = vsyncadd [#allocation3], 4294967280  ;;  %s70_s11 = sadd.s32 1, %s309_s11  }
  0x5b   : > { %p67_p4 = scmp.ge.s32.totalorder %s70_s11, 64  }
  0x5c   :  { %v73_v0 = vld [vmem:[#allocation6] sm:$0xff] (%p67_p4)  ;;  %v74_v1 = vld [vmem:[#allocation9] sm:$0xff] (%p67_p4)  ;;  %v86_v6 = vld [vmem:[#allocation2 + $0x10] sm:$0xff] (%p67_p4)  ;;  %vm110_vm0 = vcmask (%p67_p4), 7168   ;;  %vm112_vm1 = vcmask (%p67_p4), 15360   ;;  %vm114_vm2 = vcmask (%p67_p4), 23552  }
  0x5d   :  { %69 = sbr.rel (!%p67_p4) target bundleno = 89 (0x59), region = 67  ;;  %v82_v2 = vld [vmem:[#allocation2 + $0x8] sm:$0xff] (%p67_p4)  ;;  %v75_v3 = vmul.f32 (%p67_p4), %v74_v1, %v73_v0  ;;  %v78_v5 = vld [vmem:[#allocation2] sm:$0xff] (%p67_p4)  ;;  %v87_v8 = vmul.f32 (%p67_p4), %v86_v6, %v73_v0  ;;  %v90_v9 = vld [vmem:[#allocation2 + $0x18] sm:$0xff] (%p67_p4)  ;;  %vm116_vm3 = vcmask (%p67_p4), 31744   ;;  %vm118_vm4 = vcmask (%p67_p4), 39936  }
  0x5e   :  { %v83_v4 = vmul.f32 (%p67_p4), %v82_v2, %v73_v0  ;;  %v79_v7 = vmul.f32 (%p67_p4), %v78_v5, %v73_v0  ;;  %v94_v10 = vld [vmem:[#allocation2 + $0x20] sm:$0xff] (%p67_p4)  ;;  %v91_v11 = vmul.f32 (%p67_p4), %v90_v9, %v73_v0  ;;  %v98_v13 = vld [vmem:[#allocation2 + $0x28] sm:$0xff] (%p67_p4)  ;;  %v102_v14 = vld [vmem:[#allocation2 + $0x30] sm:$0xff] (%p67_p4)  ;;  %vm120_vm5 = vcmask (%p67_p4), 48128   ;;  %s315_s3 = smov (%p67_p4), [#allocation11]  }
  0x5f   :  { %76 = vadd.xlane.f32.xlu0 (%p67_p4), %v75_v3  ;;  %v95_v12 = vmul.f32 (%p67_p4), %v94_v10, %v73_v0  ;;  %v99_v15 = vmul.f32 (%p67_p4), %v98_v13, %v73_v0  ;;  %v103_v16 = vmul.f32 (%p67_p4), %v102_v14, %v73_v0  ;;  %v106_v17 = vld [vmem:[#allocation2 + $0x38] sm:$0xff] (%p67_p4)  ;;  %vm122_vm6 = vcmask (%p67_p4), 56320   ;;  %s134_s12 = sshll.u32 (%p67_p4), %s315_s3, 4  ;;  %s135_s12 = int_to_ptr.vmem [resolvable:$true] %s134_s12 }
  0x60   :  { %84 = vadd.xlane.f32.xlu1 (%p67_p4), %v83_v4  ;;  %v107_v18 = vmul.f32 (%p67_p4), %v106_v17, %v73_v0  ;;  %vm124_vm7 = vcmask (%p67_p4), 64512   ;;  %vm126_vm8 = vcmask (%p67_p4), 72704   ;;  %s263_s13 = scalar_lea.vmem (%p67_p4), %s135_s12, 128  ;;  %p268_p6 = scmp.lt.s32.totalorder (%p67_p4), %s135_s12, %s135_s12 }
  0x61   :  { %p264_p5 = scmp.ne.s32.totalorder (%p67_p4), %s135_s12, %s263_s13  ;;  %p269_p7 = scmp.lt.s32.totalorder (%p67_p4), %s263_s13, %s263_s13 }
  0x63   :  { %80 = vadd.xlane.f32.xlu0 (%p67_p4), %v79_v7  ;;  %p270_p8 = por (%p67_p4), %p269_p7, %p268_p6 }
  0x64   :  { %88 = vadd.xlane.f32.xlu1 %v87_v8 }
  0x65   :  { %p271_p9 = pnand %p270_p8, %p264_p5 }
  0x67   :  { %92 = vadd.xlane.f32.xlu0 %v91_v11 }
  0x68   :  { %96 = vadd.xlane.f32.xlu1 %v95_v12 }
  0x6b   :  { %100 = vadd.xlane.f32.xlu0 %v99_v15 }
  0x6c   :  { %104 = vadd.xlane.f32.xlu1 %v103_v16 }
  0x6f   :  { %108 = vadd.xlane.f32.xlu0 %v107_v18 }
  0xec   :  { %v77_v19 = vpop.xlane.xlu0 %76 }
  0xed   :  { %v85_v20 = vpop.xlane.xlu1 %84 }
  0xf0   :  { %v81_v21 = vpop.xlane.xlu0 %80 }
  0xf1   :  { %v89_v22 = vpop.xlane.xlu1 %88  ;;  %v111_v23 = vsel %vm110_vm0, %v77_v19, %v81_v21 }
  0xf2   :  { %v113_v24 = vsel %vm112_vm1, %v111_v23, %v85_v20 }
  0xf3   :  { %v115_v25 = vsel %vm114_vm2, %v113_v24, %v89_v22 }
  0xf4   :  { %v93_v26 = vpop.xlane.xlu0 %92 }
  0xf5   :  { %v97_v27 = vpop.xlane.xlu1 %96  ;;  %v117_v28 = vsel %vm116_vm3, %v115_v25, %v93_v26 }
  0xf6   :  { %v119_v29 = vsel %vm118_vm4, %v117_v28, %v97_v27 }
  0xf8   :  { %v101_v30 = vpop.xlane.xlu0 %100 }
  0xf9   :  { %v121_v31 = vsel %vm120_vm5, %v119_v29, %v101_v30  ;;  %v105_v32 = vpop.xlane.xlu1 %104 }
  0xfa   :  { %v123_v33 = vsel %vm122_vm6, %v121_v31, %v105_v32 }
  0xfc   :  { %v109_v34 = vpop.xlane.xlu0 %108 }
  0xfd   :  { %v125_v35 = vsel %vm124_vm7, %v123_v33, %v109_v34 }
  0xfe   :  { %127 = vst.msk [vmem:[#allocation11] sm:$0xff] %vm126_vm8, %v125_v35 }
  0xff   :  { %274 = shalt.err (!%p271_p9)
}
 0x100   :  { %s275_s16 = scalar_lea.hbm %s412_s4, 128 }
 0x101   :  { %p276_p10 = scmp.ne.s32.totalorder %s412_s4, %s275_s16  ;;  %p279_p11 = scmp.lt.u32.totalorder %s275_s16, %s412_s4 }
 0x103   :  { %p281_p12 = pnand %p279_p11, %p276_p10 }
 0x105   :  { %284 = shalt.err (!%p281_p12)
}
 0x106   :  { %137 = dma.vmem_to_hbm [thread:$0]  %s135_s12, 128, %s412_s4, [#allocation8]  }
 0x107   :  { %301 = dma.done.wait [#allocation8], 128  }
 0x108   :  { %302 = vsyncadd [#allocation8], 4294967168 }
 0x109   :  { %141 = vsyncpa [#allocation7], 1 }
 0x10a   :  { %142 = vsyncpa [#allocation10], 1 }
 0x10b   :  { %143 = vsyncpa [#allocation8], 1 }
 0x10c   :  { %144 = vsyncmov [#allocation3] }
 0x10f   :  { %s145_s22 = vpop.sfrf %144 }
 0x110   :  { %p164_p13 = scmp.ne.s32.totalorder %s145_s22, 0 }
 0x112   :  { %149 = shalt.err (%p164_p13)  }

</bundles_post_ra>
